<compile_context>
chip_gen: v7x
topology: tpu7x:2x2x1
jax: 0.10.0
libtpu: 0.0.40
codegen_flags: <defaults>
</compile_context>

<pallas_src>
import functools

import jax
import jax.numpy as jnp
import numpy as np
from jax.experimental import pallas as pl
from jax.experimental.pallas import tpu as pltpu


def _l1_partial_kernel(x_ref, y_ref, out_ref, *, rows, block_rows, need_mask):
    """Per-grid-step partial sum of |x - y| over one (block_rows, lanes) tile."""
    x = x_ref[...].astype(jnp.float32)
    y = y_ref[...].astype(jnp.float32)
    d = jnp.abs(x - y)

    if need_mask:
        # Last block overhangs the array; mask the invalid tail rows.
        row_ids = (jax.lax.broadcasted_iota(jnp.int32, d.shape, 0)
                   + pl.program_id(0) * block_rows)
        d = jnp.where(row_ids < rows, d, 0.0)

    s = jnp.sum(d)
    # Output block is a full (1, 8, 128) tile so the store is unmasked and the
    # BlockSpec trivially satisfies the (8, 128) layout rule.  Only [0, 0, 0]
    # is consumed by the wrapper.
    out_ref[...] = jnp.full(out_ref.shape, s, dtype=jnp.float32)


def l1_loss(predict, label, *, target_block_elems=512 * 1024):
    """Pallas implementation of L1Loss.forward: mean(|predict - label|)."""
    assert predict.shape == label.shape
    n = int(np.prod(predict.shape))
    x = predict.reshape(-1)
    y = label.reshape(-1)

    # Pick the widest lane-dense view that divides the element count.
    lanes = None
    for cand in (1024, 512, 256, 128):
        if n % cand == 0:
            lanes = cand
            break
    if lanes is None:
        # Rare ragged case: zero-pad both inputs identically (adds 0 to the sum).
        lanes = 128
        pad = (-n) % 128
        x = jnp.pad(x, (0, pad))
        y = jnp.pad(y, (0, pad))

    rows = x.shape[0] // lanes
    x2 = x.reshape(rows, lanes)
    y2 = y.reshape(rows, lanes)

    # Row tile: ~target_block_elems f32 per input block, sublane (8) aligned
    # unless it covers the full row extent.
    br = min(rows, max(8, target_block_elems // lanes))
    if br < rows:
        br = max(8, (br // 8) * 8)
    grid = pl.cdiv(rows, br)
    need_mask = (rows % br) != 0

    kernel = functools.partial(_l1_partial_kernel, rows=rows,
                               block_rows=br, need_mask=need_mask)

    partials = pl.pallas_call(
        kernel,
        out_shape=jax.ShapeDtypeStruct((grid, 8, 128), jnp.float32),
        grid=(grid,),
        in_specs=[
            pl.BlockSpec((br, lanes), lambda i: (i, 0)),
            pl.BlockSpec((br, lanes), lambda i: (i, 0)),
        ],
        out_specs=pl.BlockSpec((1, 8, 128), lambda i: (i, 0, 0)),
        compiler_params=pltpu.CompilerParams(
            dimension_semantics=("parallel",)),   # independent partial sums
    )(x2, y2)

    total = jnp.sum(partials[:, 0, 0])
    return total / jnp.float32(n)


if __name__ == "__main__":
    B, C, H, W = 2, 4, 16, 16
    key = jax.random.PRNGKey(0)
    k_p, k_l = jax.random.split(key)
    predict = jax.random.normal(k_p, (B, C, H, W), dtype=jnp.float32)
    label = jax.random.normal(k_l, (B, C, H, W), dtype=jnp.float32)

    loss = jax.block_until_ready(l1_loss(predict, label))

    # Pure-JAX reference of the PyTorch forward: mean(|predict - label|).
    ref = jax.block_until_ready(jnp.mean(jnp.abs(predict - label)))

    np.testing.assert_allclose(np.asarray(loss), np.asarray(ref),
                               rtol=1e-5, atol=1e-6)
    print("KERNEL_OK")
</pallas_src>

<mosaic_0001>
module attributes {stable_mosaic.version = 11 : i64} {
  func.func @_l1_partial_kernel(%arg0: i32, %arg1: memref<2x1024xf32, #tpu.memory_space<vmem>>, %arg2: memref<2x1024xf32, #tpu.memory_space<vmem>>, %arg3: memref<1x8x128xf32, #tpu.memory_space<vmem>>) attributes {dimension_semantics = [#tpu.dimension_semantics<parallel>], iteration_bounds = array<i64: 1>, scalar_prefetch = 0 : i64, scratch_operands = 0 : i64, tpu.core_type = #tpu.core_type<tc>, window_params = [{transform_indices = @transform_0, window_bounds = array<i64: 2, 1024>}, {transform_indices = @transform_1, window_bounds = array<i64: 2, 1024>}, {transform_indices = @transform_2, window_bounds = array<i64: 1, 8, 128>}]} {
    %c0 = arith.constant 0 : index
    %c0_0 = arith.constant 0 : index
    %0 = vector.load %arg1[%c0, %c0_0] : memref<2x1024xf32, #tpu.memory_space<vmem>>, vector<2x1024xf32>
    %c0_1 = arith.constant 0 : index
    %c0_2 = arith.constant 0 : index
    %1 = vector.load %arg2[%c0_1, %c0_2] : memref<2x1024xf32, #tpu.memory_space<vmem>>, vector<2x1024xf32>
    %2 = arith.subf %0, %1 : vector<2x1024xf32>
    %3 = math.absf %2 : vector<2x1024xf32>
    %4 = vector.shape_cast %3 : vector<2x1024xf32> to vector<1x2x1024xf32>
    %cst = arith.constant dense<0.000000e+00> : vector<1xf32>
    %5 = vector.multi_reduction <add>, %4, %cst [1, 2] : vector<1x2x1024xf32> to vector<1xf32>
    %6 = vector.shape_cast %5 : vector<1xf32> to vector<1x1x1xf32>
    %7 = vector.extract %6[0, 0, 0] : f32 from vector<1x1x1xf32>
    %8 = vector.broadcast %7 : f32 to vector<1x8x128xf32>
    %c0_3 = arith.constant 0 : index
    %c0_4 = arith.constant 0 : index
    %c0_5 = arith.constant 0 : index
    %9 = vector.load %arg3[%c0_3, %c0_4, %c0_5] : memref<1x8x128xf32, #tpu.memory_space<vmem>>, vector<1x8x128xf32>
    tpu.vector_store %arg3[%c0_3, %c0_4, %c0_5], %8 {strides = array<i32>} : memref<1x8x128xf32, #tpu.memory_space<vmem>>, vector<1x8x128xf32>,
    return
  }
  func.func @transform_0(%arg0: i32) -> (i32, i32) {
    %c0_i32 = arith.constant 0 : i32
    %c0_i32_0 = arith.constant 0 : i32
    return %arg0, %c0_i32 : i32, i32
  }
  func.func @transform_1(%arg0: i32) -> (i32, i32) {
    %c0_i32 = arith.constant 0 : i32
    %c0_i32_0 = arith.constant 0 : i32
    return %arg0, %c0_i32 : i32, i32
  }
  func.func @transform_2(%arg0: i32) -> (i32, i32, i32) {
    %c0_i32 = arith.constant 0 : i32
    %c0_i32_0 = arith.constant 0 : i32
    %c0_i32_1 = arith.constant 0 : i32
    return %arg0, %c0_i32, %c0_i32_0 : i32, i32, i32
  }
}

</mosaic_0001>

<bundles_post_ra>
// kernel: tpu_custom_call.1
= control target key start
LH: loop header
LB: loop body
LE: loop exit
PB: predicated region body
PF: predicated region fallthrough
CT: control target
= control target key end

     0   :  { %7 = vsyncpa [#allocation3], 0  ;;  %s272_s0 = inlined_call_operand.hbm [shape: f32[2,1024], index: 0, kind: input, shape index: {}]   ;;  %s273_s1 = inlined_call_operand.hbm [shape: f32[2,1024], index: 1, kind: input, shape index: {}]   ;;  %s274_s2 = inlined_call_operand.hbm [shape: f32[1,8,128], index: 2, kind: output, shape index: {}]  }
   0x1   :  { %8 = vsyncpa [#allocation6], 0 }
   0x2   :  { %9 = vsyncpa [#allocation4], 0  ;;  %s209_s9 = smov [#allocation2]   ;;  %s210_s11 = smov [#allocation5]  }
   0x3   :  { %s16_s10 = sshll.u32 %s209_s9, 4  ;;  %s26_s12 = sshll.u32 %s210_s11, 4  ;;  %s17_s10 = int_to_ptr.vmem [resolvable:$true] %s16_s10  ;;  %s27_s12 = int_to_ptr.vmem [resolvable:$true] %s26_s12 }
   0x4   :  { %s137_s15 = scalar_lea.hbm %s272_s0, 256 }
   0x5   :  { %p138_p0 = scmp.ne.s32.totalorder %s272_s0, %s137_s15  ;;  %p141_p1 = scmp.lt.u32.totalorder %s137_s15, %s272_s0 }
   0x7   :  { %p143_p2 = pnand %p141_p1, %p138_p0 }
   0x9   :  { %146 = shalt.err (!%p143_p2)
}
   0xa   :  { %s147_s20 = scalar_lea.vmem %s17_s10, 256  ;;  %p152_p4 = scmp.lt.s32.totalorder %s17_s10, %s17_s10 }
   0xb   :  { %p148_p3 = scmp.ne.s32.totalorder %s17_s10, %s147_s20  ;;  %p153_p5 = scmp.lt.s32.totalorder %s147_s20, %s147_s20 }
   0xd   :  { %p154_p6 = por %p153_p5, %p152_p4 }
   0xf   :  { %p155_p7 = pnand %p154_p6, %p148_p3 }
  0x11   :  { %158 = shalt.err (!%p155_p7)
}
  0x12   :  { %19 = dma.hbm_to_vmem [thread:$0]  %s272_s0, 256, %s17_s10, [#allocation3]  }
  0x13   :  { %s159_s25 = scalar_lea.hbm %s273_s1, 256 }
  0x14   :  { %p160_p8 = scmp.ne.s32.totalorder %s273_s1, %s159_s25  ;;  %p163_p9 = scmp.lt.u32.totalorder %s159_s25, %s273_s1 }
  0x16   :  { %p165_p10 = pnand %p163_p9, %p160_p8 }
  0x18   :  { %168 = shalt.err (!%p165_p10)
}
  0x19   :  { %s169_s30 = scalar_lea.vmem %s27_s12, 256  ;;  %p174_p12 = scmp.lt.s32.totalorder %s27_s12, %s27_s12 }
  0x1a   :  { %p170_p11 = scmp.ne.s32.totalorder %s27_s12, %s169_s30  ;;  %p175_p13 = scmp.lt.s32.totalorder %s169_s30, %s169_s30 }
  0x1c   :  { %p176_p0 = por %p175_p13, %p174_p12 }
  0x1e   :  { %p177_p1 = pnand %p176_p0, %p170_p11 }
  0x20   :  { %180 = shalt.err (!%p177_p1)
}
  0x21   :  { %29 = dma.hbm_to_vmem [thread:$0]  %s273_s1, 256, %s27_s12, [#allocation6]  }
  0x22   :  { %203 = dma.done.wait [#allocation3], 256  }
  0x23   :  { %204 = vsyncadd [#allocation3], 4294967040 }
  0x24   :  { %205 = dma.done.wait [#allocation6], 256  }
  0x25   :  { %206 = vsyncadd [#allocation6], 4294967040  ;;  %v50_v0 = vlaneseq  ;;  %v211_v1 = vmov 1983009808   ;;  %v36_v5 = vld [vmem:[#allocation2] sm:$0xff]  ;;  %v37_v6 = vld [vmem:[#allocation2 + $0x8] sm:$0xff] }
  0x26   :  { %v48_v2 = vunpack.c.l.s4 %v211_v1  ;;  %v38_v7 = vld [vmem:[#allocation5] sm:$0xff]  ;;  %v39_v8 = vld [vmem:[#allocation5 + $0x8] sm:$0xff]  ;;  %vm88_vm0 = vcmask 1041408   ;;  %s212_s1 = smov [#allocation7]  }
  0x27   :  { %v51_v4 = vshrl.u32 %v50_v0, 7  ;;  %v40_v9 = vsub.f32 %v36_v5, %v38_v7  ;;  %v41_v11 = vsub.f32 %v37_v6, %v39_v8  ;;  %s121_s4 = sshll.u32 %s212_s1, 4  ;;  %s122_s4 = int_to_ptr.vmem [resolvable:$true] %s121_s4 }
  0x28   :  { %v49_v3 = vunpack.c.0.s8 %v48_v2  ;;  %s181_s6 = scalar_lea.vmem %s122_s4, 128  ;;  %p186_p3 = scmp.lt.s32.totalorder %s122_s4, %s122_s4 }
  0x29   :  { %v42_v12 = vand.u32 2147483647, %v40_v9  ;;  %v43_v13 = vand.u32 2147483647, %v41_v11  ;;  %p182_p2 = scmp.ne.s32.totalorder %s122_s4, %s181_s6  ;;  %p187_p4 = scmp.lt.s32.totalorder %s181_s6, %s181_s6 }
  0x2a   :  { %v52_v10 = vsub.s32 %v49_v3, %v51_v4 }
  0x2b   :  { %v46_v14 = vcombine.high %v42_v12, %v42_v12  ;;  %v63_v16 = vcombine.high %v43_v13, %v43_v13  ;;  %p188_p5 = por %p187_p4, %p186_p3 }
  0x2c   :  { %v53_v15 = vrot.slane %v42_v12, %v52_v10  ;;  %v70_v19 = vrot.slane %v43_v13, %v52_v10 }
  0x2d   :  { %v60_v17 = vrot.slane %v46_v14, %v52_v10  ;;  %v77_v25 = vrot.slane %v63_v16, %v52_v10  ;;  %p189_p6 = pnand %p188_p5, %p182_p2 }
  0x2e   :  { %v61_v18 = vcombine.high %v53_v15, %v53_v15  ;;  %v89_v20 = vsel %vm88_vm0, %v53_v15, 0.0  ;;  %v78_v26 = vcombine.high %v70_v19, %v70_v19  ;;  %v96_v29 = vsel %vm88_vm0, %v70_v19, 0.0 }
  0x2f   :  { %v62_v21 = vcombine.high %v60_v17, %v60_v17  ;;  %v92_v23 = vsel %vm88_vm0, %v60_v17, 0.0  ;;  %v79_v31 = vcombine.high %v77_v25, %v77_v25  ;;  %v100_v34 = vsel %vm88_vm0, %v77_v25, 0.0 }
  0x30   :  { %v90_v22 = vsel %vm88_vm0, %v61_v18, 0.0  ;;  %v98_v32 = vsel %vm88_vm0, %v78_v26, 0.0 }
  0x31   :  { %v91_v24 = vadd.f32 %v90_v22, %v89_v20  ;;  %v94_v27 = vsel %vm88_vm0, %v62_v21, 0.0  ;;  %v102_v36 = vsel %vm88_vm0, %v79_v31, 0.0 }
  0x33   :  { %v93_v28 = vadd.f32 %v92_v23, %v91_v24 }
  0x35   :  { %v95_v30 = vadd.f32 %v94_v27, %v93_v28 }
  0x37   :  { %v97_v33 = vadd.f32 %v96_v29, %v95_v30 }
  0x39   :  { %v99_v35 = vadd.f32 %v98_v32, %v97_v33 }
  0x3b   :  { %v101_v37 = vadd.f32 %v100_v34, %v99_v35 }
  0x3d   :  { %v103_v38 = vadd.f32 %v102_v36, %v101_v37 }
  0x3f   :  { %104 = vadd.xlane.f32.xlu0 %v103_v38 }
  0xcc   :  { %v105_v39 = vpop.xlane.xlu0 %104 }
  0xcd   :  { %v106_v40 = vrot.slane %v105_v39, 4 }
  0xcf   :  { %v107_v41 = vadd.f32 %v106_v40, %v105_v39 }
  0xd1   :  { %v108_v42 = vrot.slane %v107_v41, 2 }
  0xd3   :  { %v109_v43 = vadd.f32 %v108_v42, %v107_v41 }
  0xd5   :  { %v110_v44 = vrot.slane %v109_v43, 1 }
  0xd7   :  { %v111_v45 = vadd.f32 %v110_v44, %v109_v43 }
  0xd9   :  { %131 = vpush %v111_v45 }
 0x10a   :  { %s132_s5 = spop %131 }
 0x10b   :  { %v113_v46 = vstv %s132_s5 }
 0x10c   :  { %114 = vst [vmem:[#allocation7] sm:$0xff] %v113_v46 }
 0x10d   :  { %192 = shalt.err (!%p189_p6)
}
 0x10e   :  { %s193_s9 = scalar_lea.hbm %s274_s2, 128 }
 0x10f   :  { %p194_p7 = scmp.ne.s32.totalorder %s274_s2, %s193_s9  ;;  %p197_p8 = scmp.lt.u32.totalorder %s193_s9, %s274_s2 }
 0x111   :  { %p199_p9 = pnand %p197_p8, %p194_p7 }
 0x113   :  { %202 = shalt.err (!%p199_p9)
}
 0x114   :  { %124 = dma.vmem_to_hbm [thread:$0]  %s122_s4, 128, %s274_s2, [#allocation4]  }
 0x115   :  { %207 = dma.done.wait [#allocation4], 128  }
 0x116   :  { %208 = vsyncadd [#allocation4], 4294967168 }
 0x117   :  { %128 = vsyncpa [#allocation3], 1 }
 0x118   :  { %129 = vsyncpa [#allocation6], 1 }
 0x119   :  { %130 = vsyncpa [#allocation4], 1 }

</bundles_post_ra>
